<compile_context>
chip_gen: v5e
topology: v5e:2x2
jax: 0.10.0
libtpu: 0.0.40
codegen_flags: <defaults>
</compile_context>

<pallas_src>
import jax
import jax.numpy as jnp
from jax import lax
from jax.experimental import pallas as pl
from jax.experimental.pallas import tpu as pltpu


# Tile preferences: large enough to approach the HBM roofline at realistic N / My
# (>=512 lanes -> ~85% of roofline per the measured tile-size sweep), small enough
# that double-buffered working sets stay far below the 32 MiB scoped-VMEM default
# (and the v7x 64 MiB physical VMEM).
_ROW_TILE_PREF = 256     # sublane axis (N rows / My rows); multiple of 8 and 16
_LANE_TILE_PREF = 512    # output last dim (My); multiple of 128 -> lane-dense stores
_VMEM_LIMIT = 32 * 1024 * 1024  # explicit, safe on v5e/v6e/v7x


def _tile(dim: int, pref: int) -> int:
    """Full dim when small (satisfies the (8,128) 'or equals full dim' rule),
    otherwise the aligned preferred tile (Pallas masks the partial last block)."""
    return dim if dim <= pref else pref


# --------------------------------------------------------------------------
# Kernel 1: row-tiled 2-layer tanh MLP   out = tanh(x @ w1 + b1) @ w2 + b2
# Used for both branch(u) -> coeffs and trunk(y0) -> bases.
# --------------------------------------------------------------------------
def _mlp2_kernel(x_ref, w1_ref, b1_ref, w2_ref, b2_ref, out_ref):
    z1 = jnp.dot(x_ref[...], w1_ref[...], preferred_element_type=jnp.float32)
    h = jnp.tanh(z1 + b1_ref[...])                      # activations / bias in f32
    z2 = jnp.dot(h.astype(w2_ref.dtype), w2_ref[...],
                 preferred_element_type=jnp.float32)
    out_ref[...] = (z2 + b2_ref[...]).astype(out_ref.dtype)


def _mlp2(x, w1, b1, w2, b2, *, out_dtype):
    R, d_in = x.shape
    _, H = w1.shape
    _, P = w2.shape
    tr = _tile(R, _ROW_TILE_PREF)
    return pl.pallas_call(
        _mlp2_kernel,
        out_shape=jax.ShapeDtypeStruct((R, P), out_dtype),
        grid=(pl.cdiv(R, tr),),
        in_specs=[
            pl.BlockSpec((tr, d_in), lambda i: (i, 0)),       # rows stream in
            pl.BlockSpec((d_in, H), lambda i: (0, 0)),        # weights resident
            pl.BlockSpec((1, H), lambda i: (0, 0)),
            pl.BlockSpec((H, P), lambda i: (0, 0)),
            pl.BlockSpec((1, P), lambda i: (0, 0)),
        ],
        out_specs=pl.BlockSpec((tr, P), lambda i: (i, 0)),
        compiler_params=pltpu.CompilerParams(
            dimension_semantics=("parallel",),
            vmem_limit_bytes=_VMEM_LIMIT),
    )(x, w1, b1, w2, b2)


# --------------------------------------------------------------------------
# Kernel 2: tiled contraction  out[n, m] = sum_p coeffs[n, p] * bases[m, p] + bias
# (== the expand/tile + elementwise product + sum(dim=2) of the reference)
# --------------------------------------------------------------------------
def _contract_kernel(coeffs_ref, bases_ref, bias_ref, out_ref):
    acc = lax.dot_general(
        coeffs_ref[...], bases_ref[...],
        dimension_numbers=(((1,), (1,)), ((), ())),   # contract last dims, no .T
        preferred_element_type=jnp.float32)
    out_ref[...] = (acc + bias_ref[0, 0]).astype(out_ref.dtype)  # scalar bias (SMEM)


def _contract(coeffs, bases, bias):
    N, P = coeffs.shape
    My, _ = bases.shape
    tm = _tile(N, _ROW_TILE_PREF)
    tn = _tile(My, _LANE_TILE_PREF)
    return pl.pallas_call(
        _contract_kernel,
        out_shape=jax.ShapeDtypeStruct((N, My), jnp.float32),
        grid=(pl.cdiv(N, tm), pl.cdiv(My, tn)),
        in_specs=[
            pl.BlockSpec((tm, P), lambda i, j: (i, 0)),       # reused across j
            pl.BlockSpec((tn, P), lambda i, j: (j, 0)),
            pl.BlockSpec(memory_space=pltpu.MemorySpace.SMEM),  # (1,1) scalar bias
        ],
        out_specs=pl.BlockSpec((tm, tn), lambda i, j: (i, j)),  # lane-dense tiles
        compiler_params=pltpu.CompilerParams(
            dimension_semantics=("parallel", "parallel"),       # 2 TCs on v7x
            vmem_limit_bytes=_VMEM_LIMIT),
    )(coeffs, bases, bias)


# --------------------------------------------------------------------------
# DeepONet forward (mirrors the PyTorch module's forward)
# --------------------------------------------------------------------------
def deeponet_forward(params, u, y_shared, y_indx=None, *,
                     compute_dtype=jnp.float32):
    """Returns s_ of shape (N, My').  compute_dtype=jnp.bfloat16 enables the
    bf16-MXU fast path (v6e/v7x); accumulation, tanh and biases stay f32."""
    assert u.ndim == 2
    assert y_shared.ndim == 3
    cd = compute_dtype

    y0 = y_shared[0]  # trunk only sees the first batch element, like the reference

    # Branch MLP, tiled over N rows.
    coeffs = _mlp2(u.astype(cd),
                   params["bw1"].astype(cd), params["bb1"],
                   params["bw2"].astype(cd), params["bb2"],
                   out_dtype=cd)
    # Trunk MLP, hoisted: computed once over y0 (independent of the N grid axis).
    bases = _mlp2(y0.astype(cd),
                  params["tw1"].astype(cd), params["tb1"],
                  params["tw2"].astype(cd), params["tb2"],
                  out_dtype=cd)

    # Reference semantics: `bases = bases[y_indx]` only when len(y_indx) < My.
    if y_indx is not None and y_indx.shape[0] < bases.shape[0]:
        bases = jnp.take(bases, y_indx, axis=0)

    return _contract(coeffs, bases, params["bias"])


def init_params(key, m_sensors, d_coord, hidden, p):
    """Deterministic synthetic parameters (shapes as the module's __init__ implies)."""
    ks = jax.random.split(key, 8)
    scale = 0.1
    return {
        # branch net: m_sensors -> hidden -> p
        "bw1": scale * jax.random.normal(ks[0], (m_sensors, hidden), jnp.float32),
        "bb1": scale * jax.random.normal(ks[1], (1, hidden), jnp.float32),
        "bw2": scale * jax.random.normal(ks[2], (hidden, p), jnp.float32),
        "bb2": scale * jax.random.normal(ks[3], (1, p), jnp.float32),
        # trunk net: d_coord -> hidden -> p
        "tw1": scale * jax.random.normal(ks[4], (d_coord, hidden), jnp.float32),
        "tb1": scale * jax.random.normal(ks[5], (1, hidden), jnp.float32),
        "tw2": scale * jax.random.normal(ks[6], (hidden, p), jnp.float32),
        "tb2": scale * jax.random.normal(ks[7], (1, p), jnp.float32),
        # DeepONet bias (torch.tensor([0.0]) in the reference); 2-D, lives in SMEM.
        "bias": jnp.zeros((1, 1), jnp.float32),
    }


def deeponet_reference(params, u, y_shared):
    """Pure-JAX reference reproducing the PyTorch forward semantics."""
    coeffs = jnp.tanh(u @ params["bw1"] + params["bb1"]) @ params["bw2"] + params["bb2"]
    y0 = y_shared[0]
    bases = jnp.tanh(y0 @ params["tw1"] + params["tb1"]) @ params["tw2"] + params["tb2"]
    N, My, _ = y_shared.shape
    coeffs_e = jnp.broadcast_to(coeffs[:, None, :], (N, My, coeffs.shape[1]))
    bases_e = jnp.broadcast_to(bases[None, :, :], (N, My, bases.shape[1]))
    return (bases_e * coeffs_e).sum(axis=2) + params["bias"][0, 0]


if __name__ == "__main__":
    # Small shapes consistent with the forward: u (N, m), y_shared (N, My, d).
    # (At these toy sizes plain XLA would be fine; the kernels are written so the
    # same code tiles and pipelines at production N / My / P.)
    N, My, M_SENSORS, D_COORD, HIDDEN, P = 8, 8, 16, 2, 32, 32

    key = jax.random.PRNGKey(0)
    k_u, k_y, k_p = jax.random.split(key, 3)

    u = jax.random.normal(k_u, (N, M_SENSORS), jnp.float32)
    y_shared = jax.random.normal(k_y, (N, My, D_COORD), jnp.float32)
    params = init_params(k_p, M_SENSORS, D_COORD, HIDDEN, P)

    s_ref = deeponet_reference(params, u, y_shared)

    # f32 path (exact, v5e-friendly).
    s = jax.block_until_ready(deeponet_forward(params, u, y_shared))  # y_indx=None path
    assert s.shape == (N, My), s.shape
    assert jnp.allclose(s, s_ref, atol=1e-5, rtol=1e-5), "f32 mismatch vs JAX reference"

    # bf16 MXU-input path (v6e/v7x fast path), f32 accumulation -> loose tolerance.
    s_bf16 = jax.block_until_ready(
        deeponet_forward(params, u, y_shared, compute_dtype=jnp.bfloat16))
    assert s_bf16.shape == (N, My), s_bf16.shape
    assert jnp.allclose(s_bf16, s_ref, atol=1e-1, rtol=1e-1), "bf16 mismatch vs JAX reference"

    print("KERNEL_OK")
</pallas_src>

<mosaic_0001>
module attributes {stable_mosaic.version = 11 : i64} {
  func.func @_mlp2_kernel(%arg0: i32, %arg1: memref<8x16xf32, #tpu.memory_space<vmem>>, %arg2: memref<16x32xf32, #tpu.memory_space<vmem>>, %arg3: memref<1x32xf32, #tpu.memory_space<vmem>>, %arg4: memref<32x32xf32, #tpu.memory_space<vmem>>, %arg5: memref<1x32xf32, #tpu.memory_space<vmem>>, %arg6: memref<8x32xf32, #tpu.memory_space<vmem>>) attributes {dimension_semantics = [#tpu.dimension_semantics<parallel>], iteration_bounds = array<i64: 1>, scalar_prefetch = 0 : i64, scratch_operands = 0 : i64, tpu.core_type = #tpu.core_type<tc>, window_params = [{transform_indices = @transform_0, window_bounds = array<i64: 8, 16>}, {pipeline_mode = #tpu.pipeline_mode<synchronous>, transform_indices = @transform_1, window_bounds = array<i64: 16, 32>}, {pipeline_mode = #tpu.pipeline_mode<synchronous>, transform_indices = @transform_2, window_bounds = array<i64: 1, 32>}, {pipeline_mode = #tpu.pipeline_mode<synchronous>, transform_indices = @transform_3, window_bounds = array<i64: 32, 32>}, {pipeline_mode = #tpu.pipeline_mode<synchronous>, transform_indices = @transform_4, window_bounds = array<i64: 1, 32>}, {transform_indices = @transform_5, window_bounds = array<i64: 8, 32>}]} {
    %c0 = arith.constant 0 : index
    %c0_0 = arith.constant 0 : index
    %0 = vector.load %arg1[%c0, %c0_0] : memref<8x16xf32, #tpu.memory_space<vmem>>, vector<8x16xf32>
    %c0_1 = arith.constant 0 : index
    %c0_2 = arith.constant 0 : index
    %1 = vector.load %arg2[%c0_1, %c0_2] : memref<16x32xf32, #tpu.memory_space<vmem>>, vector<16x32xf32>
    %cst = arith.constant dense<0.000000e+00> : vector<8x32xf32>
    %2 = tpu.matmul %0, %1, %cst {dimension_numbers = #tpu.dot_dimension_numbers<[1], [0], [0], [1], [0, 0, 1, 1], [], []>} : vector<8x16xf32>, vector<16x32xf32>, vector<8x32xf32> -> vector<8x32xf32>
    %c0_3 = arith.constant 0 : index
    %c0_4 = arith.constant 0 : index
    %3 = vector.load %arg3[%c0_3, %c0_4] : memref<1x32xf32, #tpu.memory_space<vmem>>, vector<1x32xf32>
    %4 = vector.broadcast %3 : vector<1x32xf32> to vector<8x32xf32>
    %5 = arith.addf %2, %4 : vector<8x32xf32>
    %6 = math.tanh %5 : vector<8x32xf32>
    %c0_5 = arith.constant 0 : index
    %c0_6 = arith.constant 0 : index
    %7 = vector.load %arg4[%c0_5, %c0_6] : memref<32x32xf32, #tpu.memory_space<vmem>>, vector<32x32xf32>
    %cst_7 = arith.constant dense<0.000000e+00> : vector<8x32xf32>
    %8 = tpu.matmul %6, %7, %cst_7 {dimension_numbers = #tpu.dot_dimension_numbers<[1], [0], [0], [1], [0, 0, 1, 1], [], []>} : vector<8x32xf32>, vector<32x32xf32>, vector<8x32xf32> -> vector<8x32xf32>
    %c0_8 = arith.constant 0 : index
    %c0_9 = arith.constant 0 : index
    %9 = vector.load %arg5[%c0_8, %c0_9] : memref<1x32xf32, #tpu.memory_space<vmem>>, vector<1x32xf32>
    %10 = vector.broadcast %9 : vector<1x32xf32> to vector<8x32xf32>
    %11 = arith.addf %8, %10 : vector<8x32xf32>
    %c0_10 = arith.constant 0 : index
    %c0_11 = arith.constant 0 : index
    %12 = vector.load %arg6[%c0_10, %c0_11] : memref<8x32xf32, #tpu.memory_space<vmem>>, vector<8x32xf32>
    tpu.vector_store %arg6[%c0_10, %c0_11], %11 {strides = array<i32>} : memref<8x32xf32, #tpu.memory_space<vmem>>, vector<8x32xf32>,
    return
  }
  func.func @transform_0(%arg0: i32) -> (i32, i32) {
    %c0_i32 = arith.constant 0 : i32
    %c0_i32_0 = arith.constant 0 : i32
    return %arg0, %c0_i32 : i32, i32
  }
  func.func @transform_1(%arg0: i32) -> (i32, i32) {
    %c0_i32 = arith.constant 0 : i32
    %c0_i32_0 = arith.constant 0 : i32
    %c0_i32_1 = arith.constant 0 : i32
    return %c0_i32, %c0_i32_0 : i32, i32
  }
  func.func @transform_2(%arg0: i32) -> (i32, i32) {
    %c0_i32 = arith.constant 0 : i32
    %c0_i32_0 = arith.constant 0 : i32
    %c0_i32_1 = arith.constant 0 : i32
    return %c0_i32, %c0_i32_0 : i32, i32
  }
  func.func @transform_3(%arg0: i32) -> (i32, i32) {
    %c0_i32 = arith.constant 0 : i32
    %c0_i32_0 = arith.constant 0 : i32
    %c0_i32_1 = arith.constant 0 : i32
    return %c0_i32, %c0_i32_0 : i32, i32
  }
  func.func @transform_4(%arg0: i32) -> (i32, i32) {
    %c0_i32 = arith.constant 0 : i32
    %c0_i32_0 = arith.constant 0 : i32
    %c0_i32_1 = arith.constant 0 : i32
    return %c0_i32, %c0_i32_0 : i32, i32
  }
  func.func @transform_5(%arg0: i32) -> (i32, i32) {
    %c0_i32 = arith.constant 0 : i32
    %c0_i32_0 = arith.constant 0 : i32
    return %arg0, %c0_i32 : i32, i32
  }
}

</mosaic_0001>

<bundles_post_ra>
// kernel: tpu_custom_call.1
= control target key start
LH: loop header
LB: loop body
LE: loop exit
PB: predicated region body
PF: predicated region fallthrough
CT: control target
= control target key end

     0   :  { %10 = vsyncpa [#allocation3], 0  ;;  %s317_s0 = inlined_call_operand.hbm [shape: f32[8,16], index: 0, kind: input, shape index: {}]   ;;  %s318_s1 = inlined_call_operand.hbm [shape: f32[16,32], index: 1, kind: input, shape index: {}]   ;;  %s319_s2 = inlined_call_operand.vmem [shape: f32[1,32], index: 2, kind: input, shape index: {}]   ;;  %s320_s3 = inlined_call_operand.hbm [shape: f32[32,32], index: 3, kind: input, shape index: {}]   ;;  %s321_s4 = inlined_call_operand.vmem [shape: f32[1,32], index: 4, kind: input, shape index: {}]   ;;  %s322_s5 = inlined_call_operand.hbm [shape: f32[8,32], index: 5, kind: output, shape index: {}]  }
   0x1   :  { %11 = vsyncpa [#allocation6], 0  ;;  %s28_s20 = sshll.u32 %s318_s1, 4  ;;  %s29_s20 = int_to_ptr.hbm [resolvable:$true] %s28_s20 }
   0x2   :  { %12 = vsyncpa [#allocation4], 0  ;;  %s263_s21 = smov [#allocation5]   ;;  %s18_s25 = sshll.u32 %s317_s0, 4  ;;  %s19_s25 = int_to_ptr.hbm [resolvable:$true] %s18_s25 }
   0x3   :  { %s30_s22 = sshll.u32 %s263_s21, 4  ;;  %s264_s26 = smov 128   ;;  %s31_s22 = int_to_ptr.vmem [resolvable:$true] %s30_s22 }
   0x4   :  { %s265_s27 = smov 8   ;;  %s266_s28 = smov [#allocation2]  }
   0x5   :  { %36 = dma.hbm_to_vmem [thread:$0]  %s29_s20, 256, %s31_s22, [#allocation6], %s264_s26, %s264_s26, %s265_s27  }
   0x6   :  { %s20_s29 = sshll.u32 %s266_s28, 4  ;;  %s43_s7 = sshll.u32 %s320_s3, 4  ;;  %s21_s29 = int_to_ptr.vmem [resolvable:$true] %s20_s29  ;;  %s44_s7 = int_to_ptr.hbm [resolvable:$true] %s43_s7 }
   0x7   :  { %23 = dma.hbm_to_vmem [thread:$0]  %s19_s25, 128, %s21_s29, [#allocation3]  }
   0x8   :  { %s267_s1 = smov [#allocation7]  }
   0x9   :  { %s45_s8 = sshll.u32 %s267_s1, 4  ;;  %s46_s8 = int_to_ptr.vmem [resolvable:$true] %s45_s8 }
   0xa   :  { %51 = dma.hbm_to_vmem [thread:$0]  %s44_s7, 512, %s46_s8, [#allocation6], %s264_s26, %s264_s26, %s265_s27  }
   0xb   :  { %257 = dma.done.wait [#allocation3], 128  }
   0xc   :  { %258 = vsyncadd [#allocation3], 4294967168 }
   0xd   :  { %259 = dma.done.wait [#allocation6], 768  }
   0xe   :  { %260 = vsyncadd [#allocation6], 4294966528  ;;  %v68_v0 = vld [vmem:[#allocation5 + $0x8] sm:$0xff]  ;;  %v67_v1 = vld [vmem:[#allocation5] sm:$0xff]  ;;  %vm73_vm0 = vcmask 130048   ;;  %vm106_vm1 = vcmask 261120  }
   0xf   :  { %91 = vmatpush.msra.mxu0 %v68_v0  ;;  %v66_v2 = vld [vmem:[#allocation2] sm:$0xff]  ;;  %v101_v3 = vld [vmem:[#allocation7 + $0x18] sm:$0xff]  ;;  %v100_v4 = vld [vmem:[#allocation7 + $0x10] sm:$0xff]  ;;  %s268_s11 = smov [#allocation8]   ;;  %s138_s15 = sshll.u32 %s322_s5, 4  ;;  %s139_s15 = int_to_ptr.hbm [resolvable:$true] %s138_s15 }
  0x10   :  { %122 = vmatpush.msra.mxu1 %v101_v3  ;;  %v99_v5 = vld [vmem:[#allocation7 + $0x8] sm:$0xff]  ;;  %v98_v6 = vld [vmem:[#allocation7] sm:$0xff]  ;;  %s136_s12 = sshll.u32 %s268_s11, 4  ;;  %s137_s12 = int_to_ptr.vmem [resolvable:$true] %s136_s12 }
  0x11   :  { %92 = vmatpush.msra.mxu0 %v67_v1  ;;  %v157_v7 = vld [vmem:[%s319_s2] ss:$0 sm:$0xff] }
  0x12   :  { %149 = vmatmul.msk.f32.vlgmr.msra.gmra.mxu0 %vm73_vm0, %v66_v2  ;;  %123 = vmatpush.msra.mxu1 %v100_v4  ;;  %v158_v11 = vld [vmem:[%s321_s4] ss:$0 sm:$0xff] }
  0x14   :  { %124 = vmatpush.msra.mxu1 %v99_v5 }
  0x16   :  { %125 = vmatpush.msra.mxu1 %v98_v6 }
  0x8f   :  { %v94_v8 = vpop.f32.mrf.mxu0 }
  0x90   :  { %v95_v9 = vadd.f32 %v157_v7, %v94_v8 }
  0x92   :  { %159 = vtanh.f32 %v95_v9 }
  0x98   :  { %v160_v10 = vpop.eup %159 }
  0x99   :  { %150 = vmatmul.msk.f32.vlgmr.msra.gmra.mxu1 %vm106_vm1, %v160_v10 }
 0x116   :  { %v127_v12 = vpop.f32.mrf.mxu1 }
 0x117   :  { %v128_v13 = vadd.f32 %v158_v11, %v127_v12 }
 0x119   :  { %130 = vst.msk [vmem:[#allocation8] sm:$0xff] %vm106_vm1, %v128_v13 }
 0x11a   :  { %141 = dma.vmem_to_hbm [thread:$0]  %s137_s12, 128, %s139_s15, [#allocation4]  }
 0x11b   :  { %261 = dma.done.wait [#allocation4], 128  }
 0x11c   :  { %262 = vsyncadd [#allocation4], 4294967168 }
 0x11d   :  { %146 = vsyncpa [#allocation3], 1 }
 0x11e   :  { %147 = vsyncpa [#allocation6], 1 }
 0x11f   :  { %148 = vsyncpa [#allocation4], 1 }

</bundles_post_ra>
